<compile_context>
chip_gen: v7x
topology: tpu7x:2x2x1
jax: 0.10.0
libtpu: 0.0.40
codegen_flags: <defaults>
</compile_context>

<pallas_src>
import functools

import jax
import jax.numpy as jnp
from jax.experimental import pallas as pl
from jax.experimental.pallas import tpu as pltpu


def _round_up(x: int, m: int) -> int:
    return ((x + m - 1) // m) * m


def _make_kernel(n_layers: int, has_c: bool, precision):
    """Kernel arg order: x, [c], w0_h, [w0_c], b0, w1, b1, ..., o_ref."""

    # Contract the channel (last) dim of the weight with the channel (last)
    # dim of the channels-last activation block: (Co,Ci) x (rows,Ci) -> (Co,rows).
    dn = (((1,), (1,)), ((), ()))

    def kernel(*refs):
        o_ref = refs[-1]
        it = iter(refs[:-1])
        x_ref = next(it)
        c_ref = next(it) if has_c else None

        # ---- layer 0: channels-last input -> channels-first activations ----
        w0 = next(it)[...]                               # (dim_h, C_in)
        h = jax.lax.dot_general(w0, x_ref[...], dn,
                                preferred_element_type=jnp.float32,
                                precision=precision)     # (dim_h, row_tile)
        if has_c:
            w0c = next(it)[...]                          # (dim_h, dim_c)
            h = h + jax.lax.dot_general(w0c, c_ref[...], dn,
                                        preferred_element_type=jnp.float32,
                                        precision=precision)
        h = h + next(it)[...]                            # bias (dim_h, 1)
        if n_layers > 1:
            h = jnp.maximum(h, 0.0)                      # ReLU (hidden block)

        # ---- layers 1..L-1: channels-first chain, lane dim = row_tile ----
        for i in range(1, n_layers):
            w = next(it)[...]                            # (Co_i, Ci_i)
            b = next(it)[...]                            # (Co_i, 1)
            h = jnp.dot(w, h, preferred_element_type=jnp.float32,
                        precision=precision) + b
            if i < n_layers - 1:                         # no ReLU after out_conv
                h = jnp.maximum(h, 0.0)

        o_ref[...] = h.astype(o_ref.dtype)               # (dim_out, row_tile), lane-dense

    return kernel


@functools.partial(jax.jit, static_argnames=("row_tile", "precision"))
def linear_unit(h, weights, biases, c=None, *, row_tile=4096, precision=None):
    """Fused LinearUnit forward (batch_norm=False).

    h:          (B, N, dim_in) channels-last, as in LinearUnit.forward.
    c:          optional (B, N, dim_c) conditioning (fused into the 1st matmul).
    weights[i]: (C_out_i, C_in_i)  == torch conv_i.weight[:, :, 0]
    biases[i]:  (C_out_i,)         == torch conv_i.bias
    precision:  None (1 MXU pass) or jax.lax.Precision.HIGHEST (f32-faithful).
    Returns (B, N, dim_out).
    """
    B, N, C_in = h.shape
    n_layers = len(weights)
    assert n_layers == len(biases) >= 1
    dim_out = weights[-1].shape[0]
    rows = B * N

    x_rows = h.reshape(rows, C_in)                   # free contiguous view

    if c is not None:
        assert c.shape[:2] == (B, N)
        dim_c = c.shape[-1]
        assert weights[0].shape[1] == C_in + dim_c
        c_rows = c.reshape(rows, dim_c)
        w0_h, w0_c = weights[0][:, :C_in], weights[0][:, C_in:]
    else:
        assert weights[0].shape[1] == C_in
        c_rows, w0_h, w0_c = None, weights[0], None

    # --- tile selection ---------------------------------------------------
    # row_tile is the lane dim of the compute/output block: multiple of 128
    # (or the full extent).  Force >=2 grid steps when there is enough work so
    # ("parallel",) can shard across v7x's two TensorCores.
    if rows <= 256:
        row_tile = rows                              # single full-extent block
    else:
        row_tile = _round_up(min(int(row_tile), rows), 128)
        row_tile = min(row_tile, _round_up(pl.cdiv(rows, 2), 128))
        row_tile = max(row_tile, 128)
    grid = (pl.cdiv(rows, row_tile),)                # ragged tail is masked

    operands = [x_rows]
    in_specs = [pl.BlockSpec((row_tile, C_in), lambda i: (i, 0))]
    if c is not None:
        operands.append(c_rows)
        in_specs.append(pl.BlockSpec((row_tile, c.shape[-1]), lambda i: (i, 0)))

    def _resident(a):                                # tiny array, resident each step
        operands.append(a)
        in_specs.append(pl.BlockSpec(a.shape, lambda i: (0, 0)))

    _resident(w0_h)
    if c is not None:
        _resident(w0_c)
    _resident(biases[0].reshape(-1, 1))
    for w, b in zip(weights[1:], biases[1:]):
        _resident(w)
        _resident(b.reshape(-1, 1))

    out_cf = pl.pallas_call(
        _make_kernel(n_layers, c is not None, precision),
        out_shape=jax.ShapeDtypeStruct((dim_out, rows), h.dtype),
        grid_spec=pltpu.PrefetchScalarGridSpec(
            num_scalar_prefetch=0,
            grid=grid,
            in_specs=in_specs,
            out_specs=pl.BlockSpec((dim_out, row_tile), lambda i: (0, i)),
        ),
        compiler_params=pltpu.CompilerParams(
            dimension_semantics=("parallel",)),
    )(*operands)

    # Channels-first -> channels-last: tiny (rows x dim_out) layout plumbing.
    return out_cf.T.reshape(B, N, dim_out)


def _reference(h, weights, biases, c=None):
    """Pure-JAX reference of LinearUnit.forward (batch_norm=False)."""
    if c is not None:
        h = jnp.concatenate([h, c], axis=-1)
    n = len(weights)
    for i, (w, b) in enumerate(zip(weights, biases)):
        h = jnp.einsum("bnc,hc->bnh", h, w,
                       precision=jax.lax.Precision.HIGHEST) + b
        if i < n - 1:
            h = jnp.maximum(h, 0.0)
    return h


if __name__ == "__main__":
    # Default LinearUnit config: n_block=3, batch_norm=False.
    B, N = 2, 16
    dim_in, dim_h, dim_out, dim_c = 4, 32, 4, 3
    n_block = 3

    key = jax.random.PRNGKey(0)
    keys = jax.random.split(key, 12)
    x = jax.random.normal(keys[0], (B, N, dim_in), dtype=jnp.float32)

    def make_params(in_ch):
        dims = [in_ch] + [dim_h] * n_block + [dim_out]
        ws, bs = [], []
        for i in range(n_block):   # hidden blocks: deterministic stand-in init
            ws.append(jax.random.normal(keys[1 + 2 * i], (dims[i + 1], dims[i]),
                                        dtype=jnp.float32) * 0.2)
            bs.append(jax.random.normal(keys[2 + 2 * i], (dims[i + 1],),
                                        dtype=jnp.float32) * 0.1)
        # out_conv: nn.init.normal_(std=0.05) weight, zero bias (as in __init__).
        ws.append(jax.random.normal(keys[7], (dims[-1], dims[-2]),
                                    dtype=jnp.float32) * 0.05)
        bs.append(jnp.zeros((dims[-1],), dtype=jnp.float32))
        return ws, bs

    weights, biases = make_params(dim_in)
    ref = _reference(x, weights, biases)

    # 1) f32-faithful path (HIGHEST), tight tolerance.
    out = jax.block_until_ready(
        linear_unit(x, weights, biases, precision=jax.lax.Precision.HIGHEST))
    assert out.shape == (B, N, dim_out)
    assert jnp.allclose(out, ref, atol=1e-5, rtol=1e-5), "mismatch (HIGHEST) vs reference"

    # 2) fast default-precision path (1 bf16 MXU pass / dot), loose tolerance.
    out_fast = jax.block_until_ready(linear_unit(x, weights, biases))
    assert jnp.allclose(out_fast, ref, atol=3e-2, rtol=3e-2), "mismatch (default precision)"

    # 3) conditioning path: c fused into the first matmul (no concat HBM pass).
    weights_c, biases_c = make_params(dim_in + dim_c)
    cvar = jax.random.normal(keys[9], (B, N, dim_c), dtype=jnp.float32)
    out_c = jax.block_until_ready(
        linear_unit(x, weights_c, biases_c, cvar,
                    precision=jax.lax.Precision.HIGHEST))
    ref_c = _reference(x, weights_c, biases_c, cvar)
    assert out_c.shape == (B, N, dim_out)
    assert jnp.allclose(out_c, ref_c, atol=1e-5, rtol=1e-5), "mismatch (conditioning)"

    # 4) multi-step ragged-tail path: 300 rows, row_tile=256 -> 2 grid steps
    #    (also exercises the >=2-step / v7x megacore split and masked tails).
    x2 = jax.random.normal(keys[10], (3, 100, dim_in), dtype=jnp.float32)
    out2 = jax.block_until_ready(
        linear_unit(x2, weights, biases, row_tile=256,
                    precision=jax.lax.Precision.HIGHEST))
    ref2 = _reference(x2, weights, biases)
    assert out2.shape == (3, 100, dim_out)
    assert jnp.allclose(out2, ref2, atol=1e-5, rtol=1e-5), "mismatch (ragged) vs reference"

    print("KERNEL_OK")
</pallas_src>

<mosaic_0001>
module attributes {stable_mosaic.version = 11 : i64} {
  func.func @kernel(%arg0: i32, %arg1: memref<32x4xf32, #tpu.memory_space<vmem>>, %arg2: memref<32x4xf32, #tpu.memory_space<vmem>>, %arg3: memref<32x1xf32, #tpu.memory_space<vmem>>, %arg4: memref<32x32xf32, #tpu.memory_space<vmem>>, %arg5: memref<32x1xf32, #tpu.memory_space<vmem>>, %arg6: memref<32x32xf32, #tpu.memory_space<vmem>>, %arg7: memref<32x1xf32, #tpu.memory_space<vmem>>, %arg8: memref<4x32xf32, #tpu.memory_space<vmem>>, %arg9: memref<4x1xf32, #tpu.memory_space<vmem>>, %arg10: memref<4x32xf32, #tpu.memory_space<vmem>>) attributes {dimension_semantics = [#tpu.dimension_semantics<parallel>], iteration_bounds = array<i64: 1>, scalar_prefetch = 0 : i64, scratch_operands = 0 : i64, tpu.core_type = #tpu.core_type<tc>, window_params = [{transform_indices = @transform_0, window_bounds = array<i64: 32, 4>}, {pipeline_mode = #tpu.pipeline_mode<synchronous>, transform_indices = @transform_1, window_bounds = array<i64: 32, 4>}, {pipeline_mode = #tpu.pipeline_mode<synchronous>, transform_indices = @transform_2, window_bounds = array<i64: 32, 1>}, {pipeline_mode = #tpu.pipeline_mode<synchronous>, transform_indices = @transform_3, window_bounds = array<i64: 32, 32>}, {pipeline_mode = #tpu.pipeline_mode<synchronous>, transform_indices = @transform_4, window_bounds = array<i64: 32, 1>}, {pipeline_mode = #tpu.pipeline_mode<synchronous>, transform_indices = @transform_5, window_bounds = array<i64: 32, 32>}, {pipeline_mode = #tpu.pipeline_mode<synchronous>, transform_indices = @transform_6, window_bounds = array<i64: 32, 1>}, {pipeline_mode = #tpu.pipeline_mode<synchronous>, transform_indices = @transform_7, window_bounds = array<i64: 4, 32>}, {pipeline_mode = #tpu.pipeline_mode<synchronous>, transform_indices = @transform_8, window_bounds = array<i64: 4, 1>}, {transform_indices = @transform_9, window_bounds = array<i64: 4, 32>}]} {
    %c0 = arith.constant 0 : index
    %c0_0 = arith.constant 0 : index
    %0 = vector.load %arg2[%c0, %c0_0] : memref<32x4xf32, #tpu.memory_space<vmem>>, vector<32x4xf32>
    %c0_1 = arith.constant 0 : index
    %c0_2 = arith.constant 0 : index
    %1 = vector.load %arg1[%c0_1, %c0_2] : memref<32x4xf32, #tpu.memory_space<vmem>>, vector<32x4xf32>
    %cst = arith.constant dense<0.000000e+00> : vector<32x32xf32>
    %2 = tpu.matmul %0, %1, %cst {dimension_numbers = #tpu.dot_dimension_numbers<[1], [1], [0], [0], [0, 0, 1, 0], [], []>, precision = #tpu.contract_precision<fp32>} : vector<32x4xf32>, vector<32x4xf32>, vector<32x32xf32> -> vector<32x32xf32>
    %c0_3 = arith.constant 0 : index
    %c0_4 = arith.constant 0 : index
    %3 = vector.load %arg3[%c0_3, %c0_4] : memref<32x1xf32, #tpu.memory_space<vmem>>, vector<32x1xf32>
    %4 = vector.broadcast %3 : vector<32x1xf32> to vector<32x32xf32>
    %5 = arith.addf %2, %4 : vector<32x32xf32>
    %cst_5 = arith.constant 0.000000e+00 : f32
    %6 = vector.broadcast %cst_5 : f32 to vector<32x32xf32>
    %7 = arith.maximumf %5, %6 : vector<32x32xf32>
    %c0_6 = arith.constant 0 : index
    %c0_7 = arith.constant 0 : index
    %8 = vector.load %arg4[%c0_6, %c0_7] : memref<32x32xf32, #tpu.memory_space<vmem>>, vector<32x32xf32>
    %c0_8 = arith.constant 0 : index
    %c0_9 = arith.constant 0 : index
    %9 = vector.load %arg5[%c0_8, %c0_9] : memref<32x1xf32, #tpu.memory_space<vmem>>, vector<32x1xf32>
    %cst_10 = arith.constant dense<0.000000e+00> : vector<32x32xf32>
    %10 = tpu.matmul %8, %7, %cst_10 {dimension_numbers = #tpu.dot_dimension_numbers<[1], [0], [0], [1], [0, 0, 1, 1], [], []>, precision = #tpu.contract_precision<fp32>} : vector<32x32xf32>, vector<32x32xf32>, vector<32x32xf32> -> vector<32x32xf32>
    %11 = vector.broadcast %9 : vector<32x1xf32> to vector<32x32xf32>
    %12 = arith.addf %10, %11 : vector<32x32xf32>
    %cst_11 = arith.constant 0.000000e+00 : f32
    %13 = vector.broadcast %cst_11 : f32 to vector<32x32xf32>
    %14 = arith.maximumf %12, %13 : vector<32x32xf32>
    %c0_12 = arith.constant 0 : index
    %c0_13 = arith.constant 0 : index
    %15 = vector.load %arg6[%c0_12, %c0_13] : memref<32x32xf32, #tpu.memory_space<vmem>>, vector<32x32xf32>
    %c0_14 = arith.constant 0 : index
    %c0_15 = arith.constant 0 : index
    %16 = vector.load %arg7[%c0_14, %c0_15] : memref<32x1xf32, #tpu.memory_space<vmem>>, vector<32x1xf32>
    %cst_16 = arith.constant dense<0.000000e+00> : vector<32x32xf32>
    %17 = tpu.matmul %15, %14, %cst_16 {dimension_numbers = #tpu.dot_dimension_numbers<[1], [0], [0], [1], [0, 0, 1, 1], [], []>, precision = #tpu.contract_precision<fp32>} : vector<32x32xf32>, vector<32x32xf32>, vector<32x32xf32> -> vector<32x32xf32>
    %18 = vector.broadcast %16 : vector<32x1xf32> to vector<32x32xf32>
    %19 = arith.addf %17, %18 : vector<32x32xf32>
    %cst_17 = arith.constant 0.000000e+00 : f32
    %20 = vector.broadcast %cst_17 : f32 to vector<32x32xf32>
    %21 = arith.maximumf %19, %20 : vector<32x32xf32>
    %c0_18 = arith.constant 0 : index
    %c0_19 = arith.constant 0 : index
    %22 = vector.load %arg8[%c0_18, %c0_19] : memref<4x32xf32, #tpu.memory_space<vmem>>, vector<4x32xf32>
    %c0_20 = arith.constant 0 : index
    %c0_21 = arith.constant 0 : index
    %23 = vector.load %arg9[%c0_20, %c0_21] : memref<4x1xf32, #tpu.memory_space<vmem>>, vector<4x1xf32>
    %cst_22 = arith.constant dense<0.000000e+00> : vector<4x32xf32>
    %24 = tpu.matmul %22, %21, %cst_22 {dimension_numbers = #tpu.dot_dimension_numbers<[1], [0], [0], [1], [0, 0, 1, 1], [], []>, precision = #tpu.contract_precision<fp32>} : vector<4x32xf32>, vector<32x32xf32>, vector<4x32xf32> -> vector<4x32xf32>
    %25 = vector.broadcast %23 : vector<4x1xf32> to vector<4x32xf32>
    %26 = arith.addf %24, %25 : vector<4x32xf32>
    %c0_23 = arith.constant 0 : index
    %c0_24 = arith.constant 0 : index
    %27 = vector.load %arg10[%c0_23, %c0_24] : memref<4x32xf32, #tpu.memory_space<vmem>>, vector<4x32xf32>
    tpu.vector_store %arg10[%c0_23, %c0_24], %26 {strides = array<i32>} : memref<4x32xf32, #tpu.memory_space<vmem>>, vector<4x32xf32>,
    return
  }
  func.func @transform_0(%arg0: i32) -> (i32, i32) {
    %c0_i32 = arith.constant 0 : i32
    %c0_i32_0 = arith.constant 0 : i32
    return %arg0, %c0_i32 : i32, i32
  }
  func.func @transform_1(%arg0: i32) -> (i32, i32) {
    %c0_i32 = arith.constant 0 : i32
    %c0_i32_0 = arith.constant 0 : i32
    %c0_i32_1 = arith.constant 0 : i32
    return %c0_i32, %c0_i32_0 : i32, i32
  }
  func.func @transform_2(%arg0: i32) -> (i32, i32) {
    %c0_i32 = arith.constant 0 : i32
    %c0_i32_0 = arith.constant 0 : i32
    %c0_i32_1 = arith.constant 0 : i32
    return %c0_i32, %c0_i32_0 : i32, i32
  }
  func.func @transform_3(%arg0: i32) -> (i32, i32) {
    %c0_i32 = arith.constant 0 : i32
    %c0_i32_0 = arith.constant 0 : i32
    %c0_i32_1 = arith.constant 0 : i32
    return %c0_i32, %c0_i32_0 : i32, i32
  }
  func.func @transform_4(%arg0: i32) -> (i32, i32) {
    %c0_i32 = arith.constant 0 : i32
    %c0_i32_0 = arith.constant 0 : i32
    %c0_i32_1 = arith.constant 0 : i32
    return %c0_i32, %c0_i32_0 : i32, i32
  }
  func.func @transform_5(%arg0: i32) -> (i32, i32) {
    %c0_i32 = arith.constant 0 : i32
    %c0_i32_0 = arith.constant 0 : i32
    %c0_i32_1 = arith.constant 0 : i32
    return %c0_i32, %c0_i32_0 : i32, i32
  }
  func.func @transform_6(%arg0: i32) -> (i32, i32) {
    %c0_i32 = arith.constant 0 : i32
    %c0_i32_0 = arith.constant 0 : i32
    %c0_i32_1 = arith.constant 0 : i32
    return %c0_i32, %c0_i32_0 : i32, i32
  }
  func.func @transform_7(%arg0: i32) -> (i32, i32) {
    %c0_i32 = arith.constant 0 : i32
    %c0_i32_0 = arith.constant 0 : i32
    %c0_i32_1 = arith.constant 0 : i32
    return %c0_i32, %c0_i32_0 : i32, i32
  }
  func.func @transform_8(%arg0: i32) -> (i32, i32) {
    %c0_i32 = arith.constant 0 : i32
    %c0_i32_0 = arith.constant 0 : i32
    %c0_i32_1 = arith.constant 0 : i32
    return %c0_i32, %c0_i32_0 : i32, i32
  }
  func.func @transform_9(%arg0: i32) -> (i32, i32) {
    %c0_i32 = arith.constant 0 : i32
    %c0_i32_0 = arith.constant 0 : i32
    return %c0_i32, %arg0 : i32, i32
  }
}

</mosaic_0001>

<bundles_post_ra>
// kernel: linear_unit.1
= control target key start
LH: loop header
LB: loop body
LE: loop exit
PB: predicated region body
PF: predicated region fallthrough
CT: control target
= control target key end

     0   :  { %vm64_vm0 = vcmask 31744   ;;  %v3285_v3 = vmov 0   ;;  %vm735_vm1 = vcmask 261120   ;;  %vm3287_vm2 = vmmov 0   ;;  %s3703_s0 = inlined_call_operand.vmem [shape: f32[32,4], index: 0, kind: input, shape index: {}]   ;;  %s3704_s1 = inlined_call_operand.vmem [shape: f32[32,4], index: 1, kind: input, shape index: {}]   ;;  %s3705_s2 = inlined_call_operand.vmem [shape: f32[32,1], index: 2, kind: input, shape index: {}]   ;;  %s3706_s4 = inlined_call_operand.vmem [shape: f32[32,1], index: 4, kind: input, shape index: {}]   ;;  %s3707_s6 = inlined_call_operand.vmem [shape: f32[32,1], index: 6, kind: input, shape index: {}]   ;;  %s3708_s8 = inlined_call_operand.vmem [shape: f32[4,1], index: 8, kind: input, shape index: {}]   ;;  %s3709_s3 = inlined_call_operand.vmem [shape: f32[32,32], index: 3, kind: input, shape index: {}]   ;;  %s3710_s5 = inlined_call_operand.vmem [shape: f32[32,32], index: 5, kind: input, shape index: {}]   ;;  %s3711_s7 = inlined_call_operand.vmem [shape: f32[4,32], index: 7, kind: input, shape index: {}]   ;;  %s3712_s9 = inlined_call_operand.vmem [shape: f32[4,32], index: 9, kind: output, shape index: {}]  }
   0x1   :  { %v36_v0 = vld [vmem:[%s3703_s0] sm:$0xff]  ;;  %v37_v1 = vld [vmem:[%s3703_s0 + $0x8] sm:$0xff]  ;;  %v38_v2 = vld [vmem:[%s3703_s0 + $0x10] sm:$0xff]  ;;  %3283 = vset.pattern.permute.xlu0 %v3285_v3  ;;  %3284 = vset.pattern.permute.xlu1 %v3285_v3  ;;  %vm2519_vm3 = vcmask 257024  }
   0x2   :  { %v78_v4 = vsel %vm64_vm0, %v36_v0, 0  ;;  %v81_v5 = vsel %vm64_vm0, %v37_v1, 0  ;;  %v39_v6 = vld [vmem:[%s3703_s0 + $0x18] sm:$0xff]  ;;  %v84_v7 = vsel %vm64_vm0, %v38_v2, 0  ;;  %v32_v8 = vld [vmem:[%s3704_s1] sm:$0xff]  ;;  %v33_v13 = vld [vmem:[%s3704_s1 + $0x8] sm:$0xff] }
   0x3   :  { %v90_v9 = vand.u32 4294901760, %v78_v4  ;;  %v93_v10 = vand.u32 4294901760, %v81_v5  ;;  %v87_v11 = vsel %vm64_vm0, %v39_v6, 0  ;;  %v96_v12 = vand.u32 4294901760, %v84_v7  ;;  %v34_v14 = vld [vmem:[%s3704_s1 + $0x10] sm:$0xff]  ;;  %v40_v17 = vld [vmem:[%s3705_s2] sm:$0xff] }
   0x4   :  { %v99_v15 = vand.u32 4294901760, %v87_v11  ;;  %v66_v16 = vsel %vm64_vm0, %v32_v8, 0  ;;  %46 = vperm.xlu0 %3283, %v40_v17   ;;  %v42_v22 = vld [vmem:[%s3705_s2 + $0x10] sm:$0xff]  ;;  %v69_v25 = vsel %vm64_vm0, %v33_v13, 0  ;;  %v72_v26 = vsel %vm64_vm0, %v34_v14, 0  ;;  %v41_v27 = vld [vmem:[%s3705_s2 + $0x8] sm:$0xff] }
   0x5   :  { %v3368_v18 = vpack.c.bf16 %v93_v10, %v90_v9  ;;  %v3370_v19 = vsub.f32 %v78_v4, %v90_v9  ;;  %v3372_v20 = vsub.f32 %v81_v5, %v93_v10  ;;  %v3374_v21 = vsub.f32 %v84_v7, %v96_v12  ;;  %56 = vperm.xlu1 %3284, %v42_v22   ;;  %v35_v32 = vld [vmem:[%s3704_s1 + $0x18] sm:$0xff]  ;;  %v711_v43 = vld [vmem:[%s3706_s4] sm:$0xff]  ;;  %v712_v48 = vld [vmem:[%s3706_s4 + $0x8] sm:$0xff] }
   0x6   :  { %v3379_v23 = vsub.f32 %v87_v11, %v99_v15  ;;  %v3381_v24 = vand.u32 4294901760, %v66_v16  ;;  %v3390_v30 = vpack.c.bf16 %v99_v15, %v96_v12  ;;  %v43_v33 = vld [vmem:[%s3705_s2 + $0x18] sm:$0xff]  ;;  %v3412_v38 = vand.u32 4294901760, %v69_v25  ;;  %v713_v58 = vld [vmem:[%s3706_s4 + $0x10] sm:$0xff]  ;;  %v1370_v1 = vld [vmem:[%s3707_s6] sm:$0xff] }
   0x7   :  { %v201_v28 = vand.u32 4294901760, %v3370_v19  ;;  %v208_v29 = vand.u32 4294901760, %v3372_v20  ;;  %v215_v31 = vand.u32 4294901760, %v3374_v21  ;;  %3018 = vmatprep.subr.bf16.mxu1 %v3368_v18  ;;  %v3418_v40 = vand.u32 4294901760, %v72_v26  ;;  %v714_v61 = vld [vmem:[%s3706_s4 + $0x18] sm:$0xff]  ;;  %v1371_v4 = vld [vmem:[%s3707_s6 + $0x8] sm:$0xff] }
   0x8   :  { %v222_v34 = vand.u32 4294901760, %v3379_v23  ;;  %2721 = vmatprep.mubr.f32.mxu0 %v3381_v24  ;;  %3020 = vmatpush3.bf16.xpose.msra.mxu1 %v3368_v18  ;;  %v75_v41 = vsel %vm64_vm0, %v35_v32, 0  ;;  %v3422_v42 = vsub.f32 %v66_v16, %v3381_v24  ;;  %v3428_v47 = vsub.f32 %v69_v25, %v3412_v38  ;;  %v1372_v7 = vld [vmem:[%s3707_s6 + $0x10] sm:$0xff]  ;;  %v1373_v9 = vld [vmem:[%s3707_s6 + $0x18] sm:$0xff]  ;;  %v2025_v10 = vld [vmem:[%s3708_s8] sm:$0xf] }
   0x9   :  { %v202_v35 = vsub.f32 %v3370_v19, %v201_v28  ;;  %v209_v36 = vsub.f32 %v3372_v20, %v208_v29  ;;  %v216_v37 = vsub.f32 %v3374_v21, %v215_v31  ;;  %3022 = vmatprep.subr.bf16.mxu1 %v3390_v30  ;;  %51 = vperm.xlu0 %3283, %v41_v27   ;;  %v3437_v53 = vand.u32 4294901760, %v75_v41  ;;  %v707_v14 = vld [vmem:[%s3709_s3] sm:$0xff]  ;;  %v708_v25 = vld [vmem:[%s3709_s3 + $0x8] sm:$0xff]  ;;  %v709_v27 = vld [vmem:[%s3709_s3 + $0x10] sm:$0xff] }
   0xa   :  { %v223_v39 = vsub.f32 %v3379_v23, %v222_v34  ;;  %61 = vperm.xlu1 %3284, %v43_v33   ;;  %v3434_v50 = vsub.f32 %v72_v26, %v3418_v40  ;;  %v160_v51 = vand.u32 4294901760, %v3422_v42  ;;  %v170_v54 = vand.u32 4294901760, %v3428_v47 }
   0xb   :  { %v203_v44 = vand.u32 4294901760, %v202_v35  ;;  %v210_v45 = vand.u32 4294901760, %v209_v36  ;;  %v217_v46 = vand.u32 4294901760, %v216_v37  ;;  %v189_v59 = vsub.f32 %v75_v41, %v3437_v53 }
   0xc   :  { %v224_v49 = vand.u32 4294901760, %v223_v39  ;;  %v180_v56 = vand.u32 4294901760, %v3434_v50  ;;  %v161_v57 = vsub.f32 %v3422_v42, %v160_v51  ;;  %v171_v60 = vsub.f32 %v3428_v47, %v170_v54 }
   0xd   :  { %v3025_v52 = vpack.c.bf16 %v210_v45, %v203_v44  ;;  %717 = vperm.xlu0 %3283, %v711_v43   ;;  %v190_v0 = vand.u32 4294901760, %v189_v59  ;;  %v3033_v6 = vpack.c.bf16 %v3372_v20, %v3370_v19  ;;  %v3037_v11 = vpack.c.bf16 %v3379_v23, %v3374_v21 }
   0xe   :  { %v3029_v55 = vpack.c.bf16 %v224_v49, %v217_v46  ;;  %722 = vperm.xlu1 %3284, %v712_v48   ;;  %v162_v62 = vand.u32 4294901760, %v161_v57  ;;  %v181_v63 = vsub.f32 %v3434_v50, %v180_v56  ;;  %v172_v2 = vand.u32 4294901760, %v171_v60 }
   0xf   :  { %3026 = vmatprep.subr.bf16.mxu0 %v3025_v52  ;;  %v191_v3 = vsub.f32 %v189_v59, %v190_v0  ;;  %v3049_v12 = vpack.c.bf16 %v208_v29, %v201_v28  ;;  %v3053_v13 = vpack.c.bf16 %v222_v34, %v215_v31  ;;  %v737_v15 = vsel %vm735_vm1, %v707_v14, 0  ;;  %v710_v31 = vld [vmem:[%s3709_s3 + $0x18] sm:$0xff] }
  0x10   :  { %3028 = vmatpush3.bf16.xpose.msra.mxu0 %v3025_v52  ;;  %3024 = vmatpush3.bf16.xpose.msra.mxu1 %v3390_v30  ;;  %v182_v5 = vand.u32 4294901760, %v181_v63  ;;  %v3505_v16 = vand.u32 4294901760, %v737_v15  ;;  %v740_v28 = vsel %vm735_vm1, %v708_v25, 0  ;;  %v746_v36 = vsel %vm735_vm1, %v710_v31, 0 }
  0x11   :  { %3030 = vmatprep.subr.bf16.mxu0 %v3029_v55  ;;  %727 = vperm.xlu0 %3283, %v713_v58   ;;  %v192_v8 = vand.u32 4294901760, %v191_v3  ;;  %v3525_v32 = vand.u32 4294901760, %v740_v28  ;;  %v3533_v44 = vand.u32 4294901760, %v746_v36 }
  0x12   :  { %2707 = vmatprep.mubr.f32.mxu1 %v162_v62  ;;  %732 = vperm.xlu1 %3284, %v714_v61   ;;  %v3508_v17 = vsub.f32 %v737_v15, %v3505_v16 }
  0x13   :  { %v3531_v41 = vsub.f32 %v740_v28, %v3525_v32  ;;  %v3540_v57 = vsub.f32 %v746_v36, %v3533_v44 }
  0x15   :  { %1376 = vperm.xlu0 %3283, %v1370_v1  }
  0x16   :  { %1381 = vperm.xlu1 %3284, %v1371_v4  }
  0x17   :  { %2708 = vmatmul.mubr.f32.vlgmr.msra.gmra.mrb[0].mxu1 %v172_v2 }
  0x18   :  { %3032 = vmatpush3.bf16.xpose.msra.mxu0 %v3029_v55  ;;  %2710 = vmatprep.mubr.f32.mxu1 %v182_v5  ;;  %v849_v5 = vand.u32 4294901760, %v3540_v57 }
  0x19   :  { %3034 = vmatprep.subr.bf16.mxu0 %v3033_v6  ;;  %1386 = vperm.xlu0 %3283, %v1372_v7  }
  0x1a   :  { %1391 = vperm.xlu1 %3284, %v1373_v9  }
  0x1b   :  { %2711 = vmatmul.mubr.f32.gmra.mrb[2].mxu1 %v192_v8 }
  0x1d   :  { %2028 = vperm.xlu0 %3283, %v2025_v10  }
  0x1f   :  { %2722 = vmatmul.mubr.f32.vlgmr.msra.gmra.mrb[0].mxu0 %v3412_v38 }
  0x20   :  { %3036 = vmatpush3.bf16.xpose.msra.mxu0 %v3033_v6  ;;  %2724 = vmatprep.mubr.f32.mxu0 %v3418_v40 }
  0x21   :  { %3038 = vmatprep.subr.bf16.mxu0 %v3037_v11 }
  0x23   :  { %2725 = vmatmul.mubr.f32.gmra.mrb[2].mxu0 %v3437_v53 }
  0x24   :  { %2735 = vmatprep.mubr.f32.mxu0 %v3422_v42 }
  0x28   :  { %3040 = vmatpush3.bf16.xpose.msra.mxu0 %v3037_v11 }
  0x29   :  { %3042 = vmatprep.subr.bf16.mxu0 %v3368_v18 }
  0x2f   :  { %2736 = vmatmul.mubr.f32.vlgmr.msra.gmra.mrb[0].mxu0 %v3428_v47 }
  0x30   :  { %3044 = vmatpush3.bf16.xpose.msra.mxu0 %v3368_v18  ;;  %2738 = vmatprep.mubr.f32.mxu0 %v3434_v50 }
  0x31   :  { %3046 = vmatprep.subr.bf16.mxu0 %v3390_v30 }
  0x33   :  { %2739 = vmatmul.mubr.f32.gmra.mrb[2].mxu0 %v189_v59 }
  0x34   :  { %2749 = vmatprep.mubr.f32.mxu0 %v160_v51 }
  0x38   :  { %3048 = vmatpush3.bf16.xpose.msra.mxu0 %v3390_v30 }
  0x39   :  { %3050 = vmatprep.subr.bf16.mxu0 %v3049_v12 }
  0x3f   :  { %2750 = vmatmul.mubr.f32.vlgmr.msra.gmra.mrb[0].mxu0 %v170_v54  ;;  %v829_v54 = vand.u32 4294901760, %v3531_v41 }
  0x40   :  { %3052 = vmatpush3.bf16.xpose.msra.mxu0 %v3049_v12  ;;  %2752 = vmatprep.mubr.f32.mxu0 %v180_v56 }
  0x41   :  { %3054 = vmatprep.subr.bf16.mxu0 %v3053_v13  ;;  %v830_v2 = vsub.f32 %v3531_v41, %v829_v54 }
  0x43   :  { %2753 = vmatmul.mubr.f32.gmra.mrb[2].mxu0 %v190_v0  ;;  %v831_v15 = vand.u32 4294901760, %v830_v2 }
  0x44   :  { %2763 = vmatprep.mubr.f32.mxu0 %v3381_v24 }
  0x48   :  { %3056 = vmatpush3.bf16.xpose.msra.mxu0 %v3053_v13 }
  0x49   :  { %3058 = vmatprep.subr.bf16.mxu0 %v3368_v18 }
  0x4f   :  { %2764 = vmatmul.mubr.f32.vlgmr.msra.gmra.mrb[0].mxu0 %v3412_v38 }
  0x50   :  { %3060 = vmatpush3.bf16.xpose.msra.mxu0 %v3368_v18  ;;  %2766 = vmatprep.mubr.f32.mxu0 %v3418_v40  ;;  %v819_v18 = vand.u32 4294901760, %v3508_v17 }
  0x51   :  { %3062 = vmatprep.subr.bf16.mxu0 %v3390_v30 }
  0x52   :  { %v820_v19 = vsub.f32 %v3508_v17, %v819_v18 }
  0x53   :  { %2767 = vmatmul.mubr.f32.gmra.mrb[2].mxu0 %v3437_v53 }
  0x54   :  { %2777 = vmatprep.mubr.f32.mxu0 %v3381_v24  ;;  %v821_v20 = vand.u32 4294901760, %v820_v19 }
  0x56   :  { %2791 = vmatprep.mubr.f32.mxu1 %v821_v20 }
  0x58   :  { %3064 = vmatpush3.bf16.xpose.msra.mxu0 %v3390_v30  ;;  %v743_v30 = vsel %vm735_vm1, %v709_v27, 0 }
  0x59   :  { %v3527_v35 = vand.u32 4294901760, %v743_v30 }
  0x5b   :  { %v3536_v47 = vsub.f32 %v743_v30, %v3527_v35 }
  0x5d   :  { %v839_v60 = vand.u32 4294901760, %v3536_v47 }
  0x5f   :  { %2778 = vmatmul.mubr.f32.vlgmr.msra.gmra.mrb[0].mxu0 %v3412_v38  ;;  %v840_v9 = vsub.f32 %v3536_v47, %v839_v60 }
  0x60   :  { %2780 = vmatprep.mubr.f32.mxu0 %v3418_v40 }
  0x63   :  { %2781 = vmatmul.mubr.f32.gmra.mrb[2].mxu0 %v3437_v53 }
  0x83   :  { %v47_v26 = vpop.permute.xlu0 %46 }
  0x84   :  { %v57_v29 = vpop.permute.xlu1 %56 }
  0x88   :  { %v52_v33 = vpop.permute.xlu0 %51 }
  0x89   :  { %v62_v42 = vpop.permute.xlu1 %61 }
  0xea   :  { %v2709_v21 = vpop.f32.mrb[0].mxu1 }
  0xeb   :  { %v164_v22 = vpop.f32.mrb[1].mxu1  ;;  %v175_v34 = vadd.f32 %v2709_v21, %v52_v33 }
  0xec   :  { %v165_v37 = vadd.f32 %v164_v22, %v47_v26  ;;  %v850_v22 = vsub.f32 %v3540_v57, %v849_v5 }
  0xee   :  { %v2712_v23 = vpop.f32.mrb[2].mxu1  ;;  %v851_v30 = vand.u32 4294901760, %v850_v22 }
  0xef   :  { %v184_v24 = vpop.f32.mrb[3].mxu1  ;;  %v195_v45 = vadd.f32 %v2712_v23, %v62_v42 }
  0xf0   :  { %v185_v48 = vadd.f32 %v184_v24, %v57_v29  ;;  %v841_v24 = vand.u32 4294901760, %v840_v9 }
 0x132   :  { %v2779_v38 = vpop.f32.mrb[0].mxu0 }
 0x133   :  { %v3198_v39 = vadd.f32 %v2779_v38, %v175_v34  ;;  %v681_v40 = vpop.f32.mrb[1].mxu0  ;;  %v1368_v38 = vld [vmem:[%s3710_s5 + $0x10] sm:$0xff] }
 0x134   :  { %v3200_v43 = vadd.f32 %v681_v40, %v165_v37  ;;  %v1401_v40 = vsel %vm735_vm1, %v1368_v38, 0 }
 0x135   :  { %v704_v46 = vmax.f32 %v3198_v39, 0.0 }
 0x136   :  { %v703_v49 = vmax.f32 %v3200_v43, 0.0  ;;  %v2782_v50 = vpop.f32.mrb[2].mxu0  ;;  %v723_v43 = vpop.permute.xlu1 %722 }
 0x137   :  { %v752_v51 = vand.u32 4294901760, %v704_v46  ;;  %v3202_v52 = vadd.f32 %v2782_v50, %v195_v45  ;;  %v693_v53 = vpop.f32.mrb[3].mxu0  ;;  %v3607_v45 = vand.u32 4294901760, %v1401_v40 }
 0x138   :  { %v749_v55 = vand.u32 4294901760, %v703_v49  ;;  %v3204_v56 = vadd.f32 %v693_v53, %v185_v48 }
 0x139   :  { %v866_v58 = vsub.f32 %v704_v46, %v752_v51  ;;  %v706_v59 = vmax.f32 %v3202_v52, 0.0 }
 0x13a   :  { %v3543_v61 = vpack.c.bf16 %v752_v51, %v749_v55  ;;  %v859_v62 = vsub.f32 %v703_v49, %v749_v55  ;;  %v705_v63 = vmax.f32 %v3204_v56, 0.0  ;;  %v733_v55 = vpop.permute.xlu1 %732 }
 0x13b   :  { %v867_v0 = vand.u32 4294901760, %v866_v58  ;;  %v758_v1 = vand.u32 4294901760, %v706_v59 }
 0x13c   :  { %v860_v3 = vand.u32 4294901760, %v859_v62  ;;  %v755_v4 = vand.u32 4294901760, %v705_v63  ;;  %3066 = vmatprep.subr.bf16.mxu1 %v3543_v61  ;;  %v3081_v6 = vpack.c.bf16 %v866_v58, %v859_v62 }
 0x13d   :  { %v880_v7 = vsub.f32 %v706_v59, %v758_v1  ;;  %3068 = vmatpush3.bf16.msra.mxu1 %v3543_v61  ;;  %v868_v8 = vsub.f32 %v866_v58, %v867_v0 }
 0x13e   :  { %v3069_v10 = vpack.c.bf16 %v758_v1, %v755_v4  ;;  %v873_v11 = vsub.f32 %v705_v63, %v755_v4  ;;  %v861_v12 = vsub.f32 %v859_v62, %v860_v3  ;;  %v3097_v13 = vpack.c.bf16 %v867_v0, %v860_v3 }
 0x13f   :  { %v881_v14 = vand.u32 4294901760, %v880_v7  ;;  %v869_v19 = vand.u32 4294901760, %v868_v8 }
 0x140   :  { %v874_v20 = vand.u32 4294901760, %v873_v11  ;;  %3070 = vmatprep.subr.bf16.mxu1 %v3069_v10  ;;  %v862_v21 = vand.u32 4294901760, %v861_v12  ;;  %v3085_v23 = vpack.c.bf16 %v880_v7, %v873_v11 }
 0x141   :  { %3072 = vmatpush3.bf16.msra.mxu1 %v3069_v10  ;;  %v882_v25 = vsub.f32 %v880_v7, %v881_v14 }
 0x142   :  { %v3073_v26 = vpack.c.bf16 %v869_v19, %v862_v21  ;;  %v875_v27 = vsub.f32 %v873_v11, %v874_v20  ;;  %v3101_v28 = vpack.c.bf16 %v881_v14, %v874_v20 }
 0x143   :  { %v883_v29 = vand.u32 4294901760, %v882_v25 }
 0x144   :  { %2792 = vmatmul.mubr.f32.vlgmr.msra.gmra.mrb[4].mxu1 %v831_v15  ;;  %3074 = vmatprep.subr.bf16.mxu1 %v3073_v26  ;;  %v876_v31 = vand.u32 4294901760, %v875_v27 }
 0x145   :  { %3076 = vmatpush3.bf16.msra.mxu1 %v3073_v26  ;;  %2794 = vmatprep.mubr.f32.mxu1 %v841_v24 }
 0x146   :  { %v3077_v33 = vpack.c.bf16 %v883_v29, %v876_v31 }
 0x148   :  { %2795 = vmatmul.mubr.f32.gmra.mrb[6].mxu1 %v851_v30  ;;  %3078 = vmatprep.subr.bf16.mxu1 %v3077_v33 }
 0x149   :  { %3080 = vmatpush3.bf16.msra.mxu1 %v3077_v33  ;;  %2805 = vmatprep.mubr.f32.mxu1 %v3505_v16 }
 0x14a   :  { %3082 = vmatprep.subr.bf16.mxu1 %v3081_v6 }
 0x14c   :  { %2806 = vmatmul.mubr.f32.vlgmr.msra.gmra.mrb[4].mxu1 %v3525_v32 }
 0x14d   :  { %3084 = vmatpush3.bf16.msra.mxu1 %v3081_v6  ;;  %2808 = vmatprep.mubr.f32.mxu1 %v3527_v35 }
 0x14e   :  { %3086 = vmatprep.subr.bf16.mxu1 %v3085_v23 }
 0x150   :  { %2809 = vmatmul.mubr.f32.gmra.mrb[6].mxu1 %v3533_v44 }
 0x151   :  { %3088 = vmatpush3.bf16.msra.mxu1 %v3085_v23  ;;  %2819 = vmatprep.mubr.f32.mxu1 %v3508_v17  ;;  %v1366_v17 = vld [vmem:[%s3710_s5] sm:$0xff] }
 0x152   :  { %3090 = vmatprep.subr.bf16.mxu1 %v3543_v61 }
 0x154   :  { %2820 = vmatmul.mubr.f32.vlgmr.msra.gmra.mrb[4].mxu1 %v3531_v41  ;;  %v1369_v41 = vld [vmem:[%s3710_s5 + $0x18] sm:$0xff] }
 0x155   :  { %3092 = vmatpush3.bf16.msra.mxu1 %v3543_v61  ;;  %2822 = vmatprep.mubr.f32.mxu1 %v3536_v47  ;;  %v1404_v46 = vsel %vm735_vm1, %v1369_v41, 0 }
 0x156   :  { %3094 = vmatprep.subr.bf16.mxu1 %v3069_v10  ;;  %v3613_v52 = vand.u32 4294901760, %v1404_v46 }
 0x158   :  { %2823 = vmatmul.mubr.f32.gmra.mrb[6].mxu1 %v3540_v57  ;;  %v3620_v1 = vsub.f32 %v1404_v46, %v3613_v52 }
 0x159   :  { %3096 = vmatpush3.bf16.msra.mxu1 %v3069_v10  ;;  %2833 = vmatprep.mubr.f32.mxu1 %v819_v18  ;;  %v1395_v18 = vsel %vm735_vm1, %v1366_v17, 0 }
 0x15a   :  { %3098 = vmatprep.subr.bf16.mxu1 %v3097_v13  ;;  %v3585_v34 = vand.u32 4294901760, %v1395_v18 }
 0x15c   :  { %2834 = vmatmul.mubr.f32.vlgmr.msra.gmra.mrb[4].mxu1 %v829_v54  ;;  %v3588_v36 = vsub.f32 %v1395_v18, %v3585_v34  ;;  %v3616_v54 = vsub.f32 %v1401_v40, %v3607_v45 }
 0x15d   :  { %3100 = vmatpush3.bf16.msra.mxu1 %v3097_v13  ;;  %2836 = vmatprep.mubr.f32.mxu1 %v839_v60  ;;  %v1507_v13 = vand.u32 4294901760, %v3620_v1 }
 0x15e   :  { %3102 = vmatprep.subr.bf16.mxu1 %v3101_v28  ;;  %v1477_v37 = vand.u32 4294901760, %v3588_v36  ;;  %v1497_v4 = vand.u32 4294901760, %v3616_v54 }
 0x15f   :  { %v1508_v30 = vsub.f32 %v3620_v1, %v1507_v13 }
 0x160   :  { %2837 = vmatmul.mubr.f32.gmra.mrb[6].mxu1 %v849_v5  ;;  %v1498_v20 = vsub.f32 %v3616_v54, %v1497_v4 }
 0x161   :  { %3104 = vmatpush3.bf16.msra.mxu1 %v3101_v28  ;;  %2847 = vmatprep.mubr.f32.mxu1 %v3505_v16  ;;  %v1509_v38 = vand.u32 4294901760, %v1508_v30 }
 0x162   :  { %3106 = vmatprep.subr.bf16.mxu1 %v3543_v61  ;;  %v1499_v33 = vand.u32 4294901760, %v1498_v20 }
 0x164   :  { %2848 = vmatmul.mubr.f32.vlgmr.msra.gmra.mrb[4].mxu1 %v3525_v32 }
 0x165   :  { %3108 = vmatpush3.bf16.msra.mxu1 %v3543_v61  ;;  %2850 = vmatprep.mubr.f32.mxu1 %v3527_v35 }
 0x166   :  { %3110 = vmatprep.subr.bf16.mxu1 %v3069_v10 }
 0x168   :  { %2851 = vmatmul.mubr.f32.gmra.mrb[6].mxu1 %v3533_v44 }
 0x169   :  { %3112 = vmatpush3.bf16.msra.mxu1 %v3069_v10  ;;  %2861 = vmatprep.mubr.f32.mxu1 %v3505_v16  ;;  %v1478_v16 = vsub.f32 %v3588_v36, %v1477_v37 }
 0x16c   :  { %2862 = vmatmul.mubr.f32.vlgmr.msra.gmra.mrb[4].mxu1 %v3525_v32  ;;  %v1479_v32 = vand.u32 4294901760, %v1478_v16 }
 0x16d   :  { %2864 = vmatprep.mubr.f32.mxu1 %v3527_v35  ;;  %v1367_v35 = vld [vmem:[%s3710_s5 + $0x8] sm:$0xff] }
 0x16e   :  { %v1398_v39 = vsel %vm735_vm1, %v1367_v35, 0 }
 0x16f   :  { %v3605_v42 = vand.u32 4294901760, %v1398_v39 }
 0x170   :  { %2865 = vmatmul.mubr.f32.gmra.mrb[6].mxu1 %v3533_v44  ;;  %v718_v44 = vpop.permute.xlu0 %717 }
 0x171   :  { %2875 = vmatprep.mubr.f32.mxu1 %v1479_v32  ;;  %v3611_v50 = vsub.f32 %v1398_v39, %v3605_v42 }
 0x173   :  { %v1487_v62 = vand.u32 4294901760, %v3611_v50 }
 0x174   :  { %v728_v58 = vpop.permute.xlu0 %727 }
 0x175   :  { %v1488_v10 = vsub.f32 %v3611_v50, %v1487_v62 }
 0x177   :  { %v1489_v26 = vand.u32 4294901760, %v1488_v10 }
 0x23f   :  { %v2863_v47 = vpop.f32.mrb[4].mxu1 }
 0x240   :  { %v3205_v48 = vadd.f32 %v2863_v47, %v723_v43  ;;  %v1340_v49 = vpop.f32.mrb[5].mxu1  ;;  %v1382_v43 = vpop.permute.xlu1 %1381 }
 0x241   :  { %v3206_v51 = vadd.f32 %v1340_v49, %v718_v44  ;;  %v1377_v44 = vpop.permute.xlu0 %1376 }
 0x242   :  { %v1363_v53 = vmax.f32 %v3205_v48, 0.0 }
 0x243   :  { %v1362_v56 = vmax.f32 %v3206_v51, 0.0  ;;  %v2866_v57 = vpop.f32.mrb[6].mxu1 }
 0x244   :  { %v1410_v59 = vand.u32 4294901760, %v1363_v53  ;;  %v3207_v60 = vadd.f32 %v2866_v57, %v733_v55  ;;  %v1352_v61 = vpop.f32.mrb[7].mxu1  ;;  %v1392_v51 = vpop.permute.xlu1 %1391 }
 0x245   :  { %v1407_v63 = vand.u32 4294901760, %v1362_v56  ;;  %v3208_v0 = vadd.f32 %v1352_v61, %v728_v58 }
 0x246   :  { %v1524_v2 = vsub.f32 %v1363_v53, %v1410_v59  ;;  %v1365_v3 = vmax.f32 %v3207_v60, 0.0 }
 0x247   :  { %v3623_v5 = vpack.c.bf16 %v1410_v59, %v1407_v63  ;;  %v1517_v6 = vsub.f32 %v1362_v56, %v1407_v63  ;;  %v1364_v7 = vmax.f32 %v3208_v0, 0.0 }
 0x248   :  { %v1525_v8 = vand.u32 4294901760, %v1524_v2  ;;  %v1416_v9 = vand.u32 4294901760, %v1365_v3 }
 0x249   :  { %v1518_v11 = vand.u32 4294901760, %v1517_v6  ;;  %v1413_v12 = vand.u32 4294901760, %v1364_v7  ;;  %3114 = vmatprep.subr.bf16.mxu1 %v3623_v5  ;;  %v3129_v14 = vpack.c.bf16 %v1524_v2, %v1517_v6 }
 0x24a   :  { %v1538_v15 = vsub.f32 %v1365_v3, %v1416_v9  ;;  %3116 = vmatpush3.bf16.msra.mxu1 %v3623_v5  ;;  %v1526_v19 = vsub.f32 %v1524_v2, %v1525_v8 }
 0x24b   :  { %v3117_v21 = vpack.c.bf16 %v1416_v9, %v1413_v12  ;;  %v1531_v22 = vsub.f32 %v1364_v7, %v1413_v12  ;;  %v1519_v23 = vsub.f32 %v1517_v6, %v1518_v11  ;;  %v3145_v24 = vpack.c.bf16 %v1525_v8, %v1518_v11 }
 0x24c   :  { %v1539_v25 = vand.u32 4294901760, %v1538_v15  ;;  %v1527_v27 = vand.u32 4294901760, %v1526_v19 }
 0x24d   :  { %v1532_v28 = vand.u32 4294901760, %v1531_v22  ;;  %3118 = vmatprep.subr.bf16.mxu1 %v3117_v21  ;;  %v1520_v29 = vand.u32 4294901760, %v1519_v23  ;;  %v3133_v31 = vpack.c.bf16 %v1538_v15, %v1531_v22 }
 0x24e   :  { %3120 = vmatpush3.bf16.msra.mxu1 %v3117_v21  ;;  %v1540_v17 = vsub.f32 %v1538_v15, %v1539_v25 }
 0x24f   :  { %v3121_v18 = vpack.c.bf16 %v1527_v27, %v1520_v29  ;;  %v1533_v16 = vsub.f32 %v1531_v22, %v1532_v28  ;;  %v3149_v32 = vpack.c.bf16 %v1539_v25, %v1532_v28 }
 0x250   :  { %v1541_v35 = vand.u32 4294901760, %v1540_v17 }
 0x251   :  { %2876 = vmatmul.mubr.f32.vlgmr.msra.gmra.mrb[8].mxu1 %v1489_v26  ;;  %3122 = vmatprep.subr.bf16.mxu1 %v3121_v18  ;;  %v1534_v39 = vand.u32 4294901760, %v1533_v16 }
 0x252   :  { %3124 = vmatpush3.bf16.msra.mxu1 %v3121_v18  ;;  %2878 = vmatprep.mubr.f32.mxu1 %v1499_v33 }
 0x253   :  { %v3125_v40 = vpack.c.bf16 %v1541_v35, %v1534_v39 }
 0x255   :  { %2879 = vmatmul.mubr.f32.gmra.mrb[10].mxu1 %v1509_v38  ;;  %3126 = vmatprep.subr.bf16.mxu1 %v3125_v40 }
 0x256   :  { %3128 = vmatpush3.bf16.msra.mxu1 %v3125_v40  ;;  %2889 = vmatprep.mubr.f32.mxu1 %v3585_v34 }
 0x257   :  { %3130 = vmatprep.subr.bf16.mxu1 %v3129_v14 }
 0x259   :  { %2890 = vmatmul.mubr.f32.vlgmr.msra.gmra.mrb[8].mxu1 %v3605_v42 }
 0x25a   :  { %3132 = vmatpush3.bf16.msra.mxu1 %v3129_v14  ;;  %2892 = vmatprep.mubr.f32.mxu1 %v3607_v45 }
 0x25b   :  { %3134 = vmatprep.subr.bf16.mxu1 %v3133_v31 }
 0x25d   :  { %2893 = vmatmul.mubr.f32.gmra.mrb[10].mxu1 %v3613_v52 }
 0x25e   :  { %3136 = vmatpush3.bf16.msra.mxu1 %v3133_v31  ;;  %2903 = vmatprep.mubr.f32.mxu1 %v3588_v36  ;;  %v3286_v36 = vmov 0.0|0.0  }
 0x25f   :  { %3138 = vmatprep.subr.bf16.mxu1 %v3623_v5  ;;  %3167 = vmatprep.subr.bf16.mxu0 %v3286_v36 }
 0x261   :  { %2904 = vmatmul.mubr.f32.vlgmr.msra.gmra.mrb[8].mxu1 %v3611_v50 }
 0x262   :  { %3140 = vmatpush3.bf16.msra.mxu1 %v3623_v5  ;;  %2906 = vmatprep.mubr.f32.mxu1 %v3616_v54  ;;  %v1387_v54 = vpop.permute.xlu0 %1386 }
 0x263   :  { %3142 = vmatprep.subr.bf16.mxu1 %v3117_v21 }
 0x265   :  { %2907 = vmatmul.mubr.f32.gmra.mrb[10].mxu1 %v3620_v1 }
 0x266   :  { %3144 = vmatpush3.bf16.msra.mxu1 %v3117_v21  ;;  %2917 = vmatprep.mubr.f32.mxu1 %v1477_v37  ;;  %v3288_v37 = vmov 0.0   ;;  %v2029_v33 = vpop.permute.xlu0 %2028 }
 0x267   :  { %3146 = vmatprep.subr.bf16.mxu1 %v3145_v24  ;;  %2970 = vmatprep.mubr.msk.f32.mxu0 %vm3287_vm2, %v3288_v37 }
 0x269   :  { %2918 = vmatmul.mubr.f32.vlgmr.msra.gmra.mrb[8].mxu1 %v1487_v62 }
 0x26a   :  { %3148 = vmatpush3.bf16.msra.mxu1 %v3145_v24  ;;  %2920 = vmatprep.mubr.f32.mxu1 %v1497_v4 }
 0x26b   :  { %3150 = vmatprep.subr.bf16.mxu1 %v3149_v32 }
 0x26d   :  { %2921 = vmatmul.mubr.f32.gmra.mrb[10].mxu1 %v1507_v13 }
 0x26e   :  { %3152 = vmatpush3.bf16.msra.mxu1 %v3149_v32  ;;  %2931 = vmatprep.mubr.f32.mxu1 %v3585_v34 }
 0x26f   :  { %3154 = vmatprep.subr.bf16.mxu1 %v3623_v5 }
 0x271   :  { %2932 = vmatmul.mubr.f32.vlgmr.msra.gmra.mrb[8].mxu1 %v3605_v42 }
 0x272   :  { %3156 = vmatpush3.bf16.msra.mxu1 %v3623_v5  ;;  %2934 = vmatprep.mubr.f32.mxu1 %v3607_v45 }
 0x273   :  { %3158 = vmatprep.subr.bf16.mxu1 %v3117_v21 }
 0x275   :  { %2935 = vmatmul.mubr.f32.gmra.mrb[10].mxu1 %v3613_v52 }
 0x276   :  { %3160 = vmatpush3.bf16.msra.mxu1 %v3117_v21  ;;  %2945 = vmatprep.mubr.f32.mxu1 %v3585_v34  ;;  %v2024_v34 = vld [vmem:[%s3711_s7] sm:$0xf] }
 0x277   :  { %3161 = vmatprep.subr.bf16.mxu1 %v3286_v36  ;;  %v2032_v41 = vsel %vm735_vm1, %v2024_v34, 0 }
 0x279   :  { %2946 = vmatmul.mubr.f32.vlgmr.msra.gmra.mrb[8].mxu1 %v3605_v42  ;;  %v3671_v42 = vand.u32 4294901760, %v2032_v41 }
 0x27a   :  { %2948 = vmatprep.mubr.f32.mxu1 %v3607_v45 }
 0x27b   :  { %v3674_v48 = vsub.f32 %v2032_v41, %v3671_v42 }
 0x27d   :  { %2949 = vmatmul.mubr.f32.gmra.mrb[10].mxu1 %v3613_v52  ;;  %v2105_v58 = vand.u32 4294901760, %v3674_v48 }
 0x27e   :  { %2959 = vmatprep.mubr.msk.f32.mxu1 %vm3287_vm2, %v3288_v37 }
 0x27f   :  { %v2106_v4 = vsub.f32 %v3674_v48, %v2105_v58 }
 0x281   :  { %v2107_v19 = vand.u32 4294901760, %v2106_v4 }
 0x34c   :  { %v2947_v45 = vpop.f32.mrb[8].mxu1 }
 0x34d   :  { %v3209_v46 = vadd.f32 %v2947_v45, %v1382_v43  ;;  %v1998_v47 = vpop.f32.mrb[9].mxu1 }
 0x34e   :  { %v3210_v49 = vadd.f32 %v1998_v47, %v1377_v44 }
 0x34f   :  { %v2021_v50 = vmax.f32 %v3209_v46, 0.0 }
 0x350   :  { %v2020_v52 = vmax.f32 %v3210_v49, 0.0  ;;  %v2950_v53 = vpop.f32.mrb[10].mxu1 }
 0x351   :  { %v2038_v55 = vand.u32 4294901760, %v2021_v50  ;;  %v3211_v56 = vadd.f32 %v2950_v53, %v1392_v51  ;;  %v2010_v57 = vpop.f32.mrb[11].mxu1 }
 0x352   :  { %v2035_v59 = vand.u32 4294901760, %v2020_v52  ;;  %v3212_v60 = vadd.f32 %v2010_v57, %v1387_v54 }
 0x353   :  { %v2122_v61 = vsub.f32 %v2021_v50, %v2038_v55  ;;  %v2023_v62 = vmax.f32 %v3211_v56, 0.0 }
 0x354   :  { %v3162_v63 = vpack.c.bf16 %v2038_v55, %v2035_v59  ;;  %v2115_v0 = vsub.f32 %v2020_v52, %v2035_v59  ;;  %v2022_v1 = vmax.f32 %v3212_v60, 0.0 }
 0x355   :  { %v2123_v2 = vand.u32 4294901760, %v2122_v61  ;;  %v2044_v3 = vand.u32 4294901760, %v2023_v62 }
 0x356   :  { %v2116_v5 = vand.u32 4294901760, %v2115_v0  ;;  %v2041_v6 = vand.u32 4294901760, %v2022_v1  ;;  %3163 = vmatpush3.bf16.msra.mxu1 %v3162_v63  ;;  %v3174_v7 = vpack.c.bf16 %v2122_v61, %v2115_v0 }
 0x357   :  { %v2124_v8 = vsub.f32 %v2122_v61, %v2123_v2  ;;  %v2136_v9 = vsub.f32 %v2023_v62, %v2044_v3  ;;  %3164 = vmatprep.subr.bf16.mxu1 %v3286_v36 }
 0x358   :  { %v2117_v10 = vsub.f32 %v2115_v0, %v2116_v5  ;;  %v3165_v11 = vpack.c.bf16 %v2044_v3, %v2041_v6  ;;  %v2129_v12 = vsub.f32 %v2022_v1, %v2041_v6  ;;  %v3186_v13 = vpack.c.bf16 %v2123_v2, %v2116_v5 }
 0x359   :  { %v2125_v14 = vand.u32 4294901760, %v2124_v8  ;;  %v2137_v15 = vand.u32 4294901760, %v2136_v9 }
 0x35a   :  { %v2118_v20 = vand.u32 4294901760, %v2117_v10  ;;  %v2130_v21 = vand.u32 4294901760, %v2129_v12  ;;  %3166 = vmatpush3.bf16.msra.mxu1 %v3165_v11  ;;  %v3177_v22 = vpack.c.bf16 %v2136_v9, %v2129_v12 }
 0x35b   :  { %v2138_v23 = vsub.f32 %v2136_v9, %v2137_v15 }
 0x35c   :  { %v2131_v24 = vsub.f32 %v2129_v12, %v2130_v21  ;;  %v3168_v25 = vpack.c.bf16 %v2125_v14, %v2118_v20  ;;  %v3189_v26 = vpack.c.bf16 %v2137_v15, %v2130_v21 }
 0x35d   :  { %v2139_v27 = vand.u32 4294901760, %v2138_v23  ;;  %2960 = vmatmul.mubr.f32.vlgmr.msra.gmra.mrb[12].mxu1 %v2107_v19 }
 0x35e   :  { %v2132_v28 = vand.u32 4294901760, %v2131_v24  ;;  %3169 = vmatpush3.bf16.msra.mxu0 %v3168_v25 }
 0x35f   :  { %3170 = vmatprep.subr.bf16.mxu0 %v3286_v36 }
 0x360   :  { %v3171_v29 = vpack.c.bf16 %v2139_v27, %v2132_v28 }
 0x362   :  { %3172 = vmatpush3.bf16.msra.mxu0 %v3171_v29 }
 0x363   :  { %3173 = vmatprep.subr.bf16.mxu0 %v3286_v36 }
 0x365   :  { %2971 = vmatmul.mubr.f32.vlgmr.msra.gmra.mrb[4].mxu0 %v3671_v42 }
 0x366   :  { %3175 = vmatpush3.bf16.msra.mxu0 %v3174_v7  ;;  %2981 = vmatprep.mubr.msk.f32.mxu0 %vm3287_vm2, %v3288_v37 }
 0x367   :  { %3176 = vmatprep.subr.bf16.mxu0 %v3286_v36 }
 0x36a   :  { %3178 = vmatpush3.bf16.msra.mxu0 %v3177_v22 }
 0x36b   :  { %3179 = vmatprep.subr.bf16.mxu0 %v3286_v36 }
 0x36d   :  { %2982 = vmatmul.mubr.f32.vlgmr.msra.gmra.mrb[4].mxu0 %v3674_v48 }
 0x36e   :  { %3181 = vmatpush3.bf16.msra.mxu0 %v3162_v63  ;;  %2992 = vmatprep.mubr.msk.f32.mxu0 %vm3287_vm2, %v3288_v37 }
 0x36f   :  { %3182 = vmatprep.subr.bf16.mxu0 %v3286_v36 }
 0x372   :  { %3184 = vmatpush3.bf16.msra.mxu0 %v3165_v11 }
 0x373   :  { %3185 = vmatprep.subr.bf16.mxu0 %v3286_v36 }
 0x375   :  { %2993 = vmatmul.mubr.f32.vlgmr.msra.gmra.mrb[4].mxu0 %v2105_v58 }
 0x376   :  { %3187 = vmatpush3.bf16.msra.mxu0 %v3186_v13  ;;  %3003 = vmatprep.mubr.msk.f32.mxu0 %vm3287_vm2, %v3288_v37 }
 0x377   :  { %3188 = vmatprep.subr.bf16.mxu0 %v3286_v36 }
 0x37a   :  { %3190 = vmatpush3.bf16.msra.mxu0 %v3189_v26 }
 0x37b   :  { %3191 = vmatprep.subr.bf16.mxu0 %v3286_v36 }
 0x37d   :  { %3004 = vmatmul.mubr.f32.vlgmr.msra.gmra.mrb[4].mxu0 %v3671_v42 }
 0x37e   :  { %3193 = vmatpush3.bf16.msra.mxu0 %v3162_v63  ;;  %3014 = vmatprep.mubr.msk.f32.mxu0 %vm3287_vm2, %v3288_v37 }
 0x37f   :  { %3194 = vmatprep.subr.bf16.mxu0 %v3286_v36 }
 0x382   :  { %3196 = vmatpush3.bf16.msra.mxu0 %v3165_v11 }
 0x385   :  { %3015 = vmatmul.mubr.f32.vlgmr.msra.gmra.mrb[4].mxu0 %v3671_v42 }
 0x430   :  { %v2109_v30 = vpop.f32.mrb[12].mxu1 }
 0x431   :  { %v2961_v31 = vpop.f32.mrb[13].mxu1  ;;  %v2110_v17 = vadd.f32 %v2109_v30, %v2029_v33 }
 0x458   :  { %v2515_v18 = vpop.f32.mrb[4].mxu0 }
 0x459   :  { %v3214_v16 = vadd.f32 %v2515_v18, %v2110_v17  ;;  %v3016_v32 = vpop.f32.mrb[5].mxu0 }
 0x45b   :  { %2520 = vst.msk [vmem:[%s3712_s9] sm:$0xf] %vm2519_vm3, %v3214_v16 }

</bundles_post_ra>
